<compile_context>
chip_gen: v7x
topology: tpu7x:2x2x1
jax: 0.10.0
libtpu: 0.0.40
codegen_flags: <defaults>
</compile_context>

<pallas_src>
import functools

import jax
import jax.numpy as jnp
from jax.experimental import pallas as pl
from jax.experimental.pallas import tpu as pltpu


def _round_up(x, m):
    return ((x + m - 1) // m) * m


def _seq_pool_kernel(x_ref, aux_ref, o_ref, *, mode, eps, aux_is_mask):
    # x_ref: (tb, T, te); aux_ref: (tb, T, 1) f32 mask  OR  (tb, 1, 1) i32 lengths.
    x = x_ref[...].astype(jnp.float32)            # cast in vregs; DMA stays native

    if aux_is_mask:
        mask = aux_ref[...]                       # (tb, T, 1) f32, broadcasts on lanes
        if mode == "max":
            hist = jnp.max(x - (1.0 - mask) * 1e9, axis=1, keepdims=True)
        else:
            hist = jnp.sum(x * mask, axis=1, keepdims=True)          # (tb, 1, te)
            if mode == "mean":
                lens = jnp.sum(mask, axis=1, keepdims=True)          # (tb, 1, 1)
                hist = hist / (lens + eps)
    else:
        lens = aux_ref[...]                       # (tb, 1, 1) int32
        t_idx = jax.lax.broadcasted_iota(jnp.int32, x.shape, 1)      # position along T
        valid = t_idx < lens                      # (tb, T, te) bool, prefix mask
        if mode == "max":
            # x - (1 - mask) * 1e9  ==  where(valid, x, x - 1e9)
            hist = jnp.max(jnp.where(valid, x, x - 1e9), axis=1, keepdims=True)
        else:
            hist = jnp.sum(jnp.where(valid, x, 0.0), axis=1, keepdims=True)
            if mode == "mean":
                hist = hist / (lens.astype(jnp.float32) + eps)

    o_ref[...] = hist.astype(o_ref.dtype)


def _pick_tiles(B, T, E, itemsize, aux_row_bytes):
    # Lane tile: lane-dense output; collapse the E grid axis when E is small.
    if E <= 512 or E % 128 != 0:
        te = E
    elif E % 512 == 0:
        te = 512
    elif E % 256 == 0:
        te = 256
    else:
        te = 128

    T_pad = _round_up(T, 8)
    te_pad = _round_up(te, 128)
    # Physical VMEM bytes one batch row occupies ((8,128)-tiled layout).
    x_row = T_pad * te_pad * itemsize
    o_row = 8 * te_pad * itemsize
    per_row = x_row + o_row + aux_row_bytes

    budget = 10 * 1024 * 1024                    # target working set per grid step
    tb_max = max(1, min(B, budget // per_row))
    nb = -(-B // tb_max)                         # number of batch blocks
    tb = -(-B // nb)                             # balanced -> minimal batch padding
    return tb, te, nb


def sequence_pooling(seq_value, seq_len=None, mask=None, *, mode="mean",
                     supports_masking=False, eps=1e-8):
    """seq_value: [B, T, E]; seq_len: [B, 1] ints, or mask: [B, T].

    Returns [B, 1, E] with the same dtype as seq_value."""
    assert mode in ("sum", "mean", "max")
    B, T, E = seq_value.shape
    itemsize = jnp.dtype(seq_value.dtype).itemsize
    T_pad = _round_up(T, 8)

    if supports_masking:
        if mask is None:
            raise ValueError("mask is required when supports_masking=True")
        aux = mask.astype(jnp.float32).reshape(B, T, 1)
        aux_row_bytes = T_pad * 128 * 4           # (tb, T, 1) f32 block, lane-padded
        aux_block = lambda tb: (tb, T, 1)
    else:
        if seq_len is None:
            raise ValueError("seq_len is required when supports_masking=False")
        aux = seq_len.reshape(B, 1, 1).astype(jnp.int32)
        aux_row_bytes = 8 * 128 * 4               # (tb, 1, 1) i32 block, tile-padded
        aux_block = lambda tb: (tb, 1, 1)

    tb, te, nb = _pick_tiles(B, T, E, itemsize, aux_row_bytes)
    Bp = nb * tb
    if Bp != B:
        pad = Bp - B
        seq_value = jnp.pad(seq_value, ((0, pad), (0, 0), (0, 0)))
        aux = jnp.pad(aux, ((0, pad), (0, 0), (0, 0)))

    grid = (nb, E // te)

    x_spec = pl.BlockSpec((tb, T, te), lambda i, j: (i, 0, j))
    a_spec = pl.BlockSpec(aux_block(tb), lambda i, j: (i, 0, 0))
    o_spec = pl.BlockSpec((tb, 1, te), lambda i, j: (i, 0, j))

    # Explicit VMEM limit: double-buffered physical block footprint + headroom.
    te_pad = _round_up(te, 128)
    step_bytes = tb * (T_pad * te_pad * itemsize      # x block
                       + aux_row_bytes                # mask / length block
                       + 8 * te_pad * itemsize)       # output block
    vmem_bytes = int(min(max(2 * step_bytes + (2 << 20), 4 << 20), 64 << 20))

    kernel = functools.partial(_seq_pool_kernel, mode=mode, eps=eps,
                               aux_is_mask=supports_masking)

    out = pl.pallas_call(
        kernel,
        out_shape=jax.ShapeDtypeStruct((Bp, 1, E), seq_value.dtype),
        grid_spec=pltpu.PrefetchScalarGridSpec(
            num_scalar_prefetch=0,
            grid=grid,
            in_specs=[x_spec, a_spec],
            out_specs=o_spec,
        ),
        compiler_params=pltpu.CompilerParams(
            dimension_semantics=("parallel", "parallel"),
            vmem_limit_bytes=vmem_bytes,
        ),
    )(seq_value, aux)

    return out[:B]


def _seq_pool_ref(x, seq_len=None, mask=None, mode="mean", eps=1e-8):
    """Pure-JAX reference mirroring the PyTorch forward."""
    B, T, E = x.shape
    if mask is not None:
        maskf = mask.astype(jnp.float32)
        ubl = jnp.sum(maskf, axis=-1, keepdims=True)
    else:
        ubl = seq_len.reshape(B, 1).astype(jnp.float32)
        maskf = (jnp.arange(T, dtype=jnp.float32)[None, :] < ubl).astype(jnp.float32)
    m3 = maskf[:, :, None]
    xf = x.astype(jnp.float32)
    if mode == "max":
        return jnp.max(xf - (1.0 - m3) * 1e9, axis=1, keepdims=True).astype(x.dtype)
    hist = jnp.sum(xf * m3, axis=1, keepdims=False)
    if mode == "mean":
        hist = hist / (ubl + eps)
    return hist[:, None, :].astype(x.dtype)


if __name__ == "__main__":
    key = jax.random.PRNGKey(0)
    kx, kl, km = jax.random.split(key, 3)

    B, T, E = 4, 8, 32
    x = jax.random.normal(kx, (B, T, E), jnp.float32)
    seq_len = jax.random.randint(kl, (B, 1), 1, T + 1).astype(jnp.int32)

    # supports_masking=False path (lengths -> prefix mask), all three modes.
    for mode in ("sum", "mean", "max"):
        out = jax.block_until_ready(sequence_pooling(x, seq_len=seq_len, mode=mode))
        ref = _seq_pool_ref(x, seq_len=seq_len, mode=mode)
        assert out.shape == (B, 1, E) and out.dtype == x.dtype
        assert jnp.allclose(out, ref, atol=1e-5, rtol=1e-5), mode

    # supports_masking=True path (explicit mask), all three modes.
    mask = (jax.random.uniform(km, (B, T)) > 0.4).astype(jnp.float32)
    mask = mask.at[:, 0].set(1.0)   # ensure every row has at least one valid step
    for mode in ("sum", "mean", "max"):
        out = jax.block_until_ready(
            sequence_pooling(x, mask=mask, mode=mode, supports_masking=True))
        ref = _seq_pool_ref(x, mask=mask, mode=mode)
        assert out.shape == (B, 1, E) and out.dtype == x.dtype
        assert jnp.allclose(out, ref, atol=1e-5, rtol=1e-5), mode

    print("KERNEL_OK")
</pallas_src>

<mosaic_0001>
module attributes {stable_mosaic.version = 11 : i64} {
  func.func @_seq_pool_kernel(%arg0: i32, %arg1: i32, %arg2: memref<4x8x32xf32, #tpu.memory_space<vmem>>, %arg3: memref<4x1x1xi32, #tpu.memory_space<vmem>>, %arg4: memref<4x1x32xf32, #tpu.memory_space<vmem>>) attributes {dimension_semantics = [#tpu.dimension_semantics<parallel>, #tpu.dimension_semantics<parallel>], iteration_bounds = array<i64: 1, 1>, scalar_prefetch = 0 : i64, scratch_operands = 0 : i64, tpu.core_type = #tpu.core_type<tc>, window_params = [{transform_indices = @transform_0, window_bounds = array<i64: 4, 8, 32>}, {transform_indices = @transform_1, window_bounds = array<i64: 4, 1, 1>}, {transform_indices = @transform_2, window_bounds = array<i64: 4, 1, 32>}]} {
    %c0 = arith.constant 0 : index
    %c0_0 = arith.constant 0 : index
    %c0_1 = arith.constant 0 : index
    %0 = vector.load %arg2[%c0, %c0_0, %c0_1] : memref<4x8x32xf32, #tpu.memory_space<vmem>>, vector<4x8x32xf32>
    %c0_2 = arith.constant 0 : index
    %c0_3 = arith.constant 0 : index
    %c0_4 = arith.constant 0 : index
    %1 = vector.load %arg3[%c0_2, %c0_3, %c0_4] : memref<4x1x1xi32, #tpu.memory_space<vmem>>, vector<4x1x1xi32>
    %2 = tpu.iota {dimensions = array<i32: 1>} : vector<4x8x32xi32>
    %3 = vector.broadcast %1 : vector<4x1x1xi32> to vector<4x8x32xi32>
    %4 = arith.cmpi slt, %2, %3 : vector<4x8x32xi32>
    %cst = arith.constant 0.000000e+00 : f32
    %5 = vector.broadcast %cst : f32 to vector<4x8x32xf32>
    %6 = arith.select %4, %0, %5 : vector<4x8x32xi1>, vector<4x8x32xf32>
    %cst_5 = arith.constant dense<0.000000e+00> : vector<4x32xf32>
    %7 = vector.multi_reduction <add>, %6, %cst_5 [1] : vector<4x8x32xf32> to vector<4x32xf32>
    %8 = vector.shape_cast %7 : vector<4x32xf32> to vector<4x1x32xf32>
    %c0_6 = arith.constant 0 : index
    %c0_7 = arith.constant 0 : index
    %c0_8 = arith.constant 0 : index
    %9 = vector.load %arg4[%c0_6, %c0_7, %c0_8] : memref<4x1x32xf32, #tpu.memory_space<vmem>>, vector<4x1x32xf32>
    tpu.vector_store %arg4[%c0_6, %c0_7, %c0_8], %8 {strides = array<i32>} : memref<4x1x32xf32, #tpu.memory_space<vmem>>, vector<4x1x32xf32>,
    return
  }
  func.func @transform_0(%arg0: i32, %arg1: i32) -> (i32, i32, i32) {
    %c0_i32 = arith.constant 0 : i32
    %c0_i32_0 = arith.constant 0 : i32
    return %arg0, %c0_i32, %arg1 : i32, i32, i32
  }
  func.func @transform_1(%arg0: i32, %arg1: i32) -> (i32, i32, i32) {
    %c0_i32 = arith.constant 0 : i32
    %c0_i32_0 = arith.constant 0 : i32
    %c0_i32_1 = arith.constant 0 : i32
    return %arg0, %c0_i32, %c0_i32_0 : i32, i32, i32
  }
  func.func @transform_2(%arg0: i32, %arg1: i32) -> (i32, i32, i32) {
    %c0_i32 = arith.constant 0 : i32
    %c0_i32_0 = arith.constant 0 : i32
    return %arg0, %c0_i32, %arg1 : i32, i32, i32
  }
}

</mosaic_0001>

<bundles_post_ra>
// kernel: tpu_custom_call.1
= control target key start
LH: loop header
LB: loop body
LE: loop exit
PB: predicated region body
PF: predicated region fallthrough
CT: control target
= control target key end

     0   :  { %7 = vsyncpa [#allocation3], 0  ;;  %s246_s0 = inlined_call_operand.hbm [shape: f32[4,8,32], index: 0, kind: input, shape index: {}]   ;;  %s247_s1 = inlined_call_operand.vmem [shape: s32[4,1,1], index: 1, kind: input, shape index: {}]   ;;  %s248_s2 = inlined_call_operand.hbm [shape: f32[4,1,32], index: 2, kind: output, shape index: {}]  }
   0x1   :  { %8 = vsyncpa [#allocation4], 0  ;;  %s184_s9 = smov [#allocation2]   ;;  %s136_s13 = scalar_lea.hbm %s246_s0, 512 }
   0x2   :  { %s14_s10 = sshll.u32 %s184_s9, 4  ;;  %p137_p0 = scmp.ne.s32.totalorder %s246_s0, %s136_s13  ;;  %s15_s10 = int_to_ptr.vmem [resolvable:$true] %s14_s10 }
   0x3   :  { %p140_p1 = scmp.lt.u32.totalorder %s136_s13, %s246_s0 }
   0x5   :  { %p142_p2 = pnand %p140_p1, %p137_p0 }
   0x7   :  { %145 = shalt.err (!%p142_p2)
}
   0x8   :  { %s146_s18 = scalar_lea.vmem %s15_s10, 512  ;;  %p151_p4 = scmp.lt.s32.totalorder %s15_s10, %s15_s10 }
   0x9   :  { %p147_p3 = scmp.ne.s32.totalorder %s15_s10, %s146_s18  ;;  %p152_p5 = scmp.lt.s32.totalorder %s146_s18, %s146_s18 }
   0xb   :  { %p153_p6 = por %p152_p5, %p151_p4 }
   0xd   :  { %p154_p7 = pnand %p153_p6, %p147_p3 }
   0xf   :  { %157 = shalt.err (!%p154_p7)
}
  0x10   :  { %s185_s19 = smov 128   ;;  %s186_s20 = smov 8  }
  0x11   :  { %20 = dma.hbm_to_vmem [thread:$0]  %s246_s0, 512, %s15_s10, [#allocation3], %s185_s19, %s185_s19, %s186_s20  }
  0x12   :  { %180 = dma.done.wait [#allocation3], 512  }
  0x13   :  { %181 = vsyncadd [#allocation3], 4294966784  ;;  %v187_v0 = vmov 0   ;;  %v125_v1 = vld [vmem:[%s247_s1 + $0x2] ss:$0 sm:$0xff]  ;;  %v34_v5 = vlaneseq  ;;  %v28_v7 = vld [vmem:[#allocation2 + $0x10] sm:$0xff] }
  0x14   :  { %135 = vset.pattern.permute.xlu1 %v187_v0  ;;  %134 = vset.pattern.permute.xlu0 %v187_v0  ;;  %v123_v2 = vld [vmem:[%s247_s1] ss:$0 sm:$0xff]  ;;  %v126_v3 = vld [vmem:[%s247_s1 + $0x3] ss:$0 sm:$0xff]  ;;  %v124_v4 = vld [vmem:[%s247_s1 + $0x1] ss:$0 sm:$0xff] }
  0x15   :  { %59 = vperm.xlu1 %135, %v125_v1   ;;  %53 = vperm.xlu0 %134, %v123_v2   ;;  %v35_v6 = vshrl.u32 %v34_v5, 7  ;;  %v26_v8 = vld [vmem:[#allocation2] sm:$0xff]  ;;  %vm72_vm0 = vcmask 261120   ;;  %v29_v15 = vld [vmem:[#allocation2 + $0x18] sm:$0xff]  ;;  %v27_v16 = vld [vmem:[#allocation2 + $0x8] sm:$0xff]  ;;  %vm101_vm5 = vcmask 253952  }
  0x16   :  { %s188_s1 = smov [#allocation5]  }
  0x17   :  { %s111_s30 = sshll.u32 %s188_s1, 4  ;;  %s112_s30 = int_to_ptr.vmem [resolvable:$true] %s111_s30 }
  0x18   :  { %s158_s3 = scalar_lea.vmem %s112_s30, 64  ;;  %p163_p9 = scmp.lt.s32.totalorder %s112_s30, %s112_s30 }
  0x19   :  { %62 = vperm.xlu1 %135, %v126_v3   ;;  %56 = vperm.xlu0 %134, %v124_v4   ;;  %p159_p8 = scmp.ne.s32.totalorder %s112_s30, %s158_s3  ;;  %p164_p10 = scmp.lt.s32.totalorder %s158_s3, %s158_s3 }
  0x1b   :  { %p165_p11 = por %p164_p10, %p163_p9 }
  0x1d   :  { %p166_p12 = pnand %p165_p11, %p159_p8 }
  0x94   :  { %v60_v9 = vpop.permute.xlu1 %59  ;;  %v54_v10 = vpop.permute.xlu0 %53 }
  0x95   :  { %vm66_vm1 = vcmp.lt.s32.totalorder %v35_v6, %v60_v9  ;;  %vm64_vm2 = vcmp.lt.s32.totalorder %v35_v6, %v54_v10 }
  0x96   :  { %v70_v11 = vsel %vm66_vm1, %v28_v7, 0.0  ;;  %v68_v12 = vsel %vm64_vm2, %v26_v8, 0.0 }
  0x97   :  { %v87_v13 = vsel %vm72_vm0, %v70_v11, 0.0  ;;  %v73_v14 = vsel %vm72_vm0, %v68_v12, 0.0 }
  0x98   :  { %v88_v17 = vrot.slane %v87_v13, 4  ;;  %v74_v18 = vrot.slane %v73_v14, 4  ;;  %v63_v19 = vpop.permute.xlu1 %62  ;;  %v57_v20 = vpop.permute.xlu0 %56 }
  0x99   :  { %vm67_vm3 = vcmp.lt.s32.totalorder %v35_v6, %v63_v19  ;;  %vm65_vm4 = vcmp.lt.s32.totalorder %v35_v6, %v57_v20 }
  0x9a   :  { %v89_v21 = vadd.f32 %v88_v17, %v87_v13  ;;  %v75_v22 = vadd.f32 %v74_v18, %v73_v14  ;;  %v71_v23 = vsel %vm67_vm3, %v29_v15, 0.0  ;;  %v69_v24 = vsel %vm65_vm4, %v27_v16, 0.0 }
  0x9b   :  { %v94_v25 = vsel %vm72_vm0, %v71_v23, 0.0  ;;  %v80_v26 = vsel %vm72_vm0, %v69_v24, 0.0 }
  0x9c   :  { %v90_v27 = vrot.slane %v89_v21, 2  ;;  %v76_v28 = vrot.slane %v75_v22, 2  ;;  %v95_v29 = vrot.slane %v94_v25, 4  ;;  %v81_v30 = vrot.slane %v80_v26, 4 }
  0x9e   :  { %v91_v31 = vadd.f32 %v90_v27, %v89_v21  ;;  %v77_v32 = vadd.f32 %v76_v28, %v75_v22  ;;  %v96_v33 = vadd.f32 %v95_v29, %v94_v25  ;;  %v82_v34 = vadd.f32 %v81_v30, %v80_v26 }
  0xa0   :  { %v92_v35 = vrot.slane %v91_v31, 1  ;;  %v78_v36 = vrot.slane %v77_v32, 1  ;;  %v97_v37 = vrot.slane %v96_v33, 2  ;;  %v83_v38 = vrot.slane %v82_v34, 2 }
  0xa2   :  { %v93_v39 = vadd.f32 %v92_v35, %v91_v31  ;;  %v79_v40 = vadd.f32 %v78_v36, %v77_v32  ;;  %v98_v41 = vadd.f32 %v97_v37, %v96_v33  ;;  %v84_v42 = vadd.f32 %v83_v38, %v82_v34 }
  0xa4   :  { %104 = vst.msk [vmem:[#allocation5 + $0x2] sm:$0x1] %vm101_vm5, %v93_v39  ;;  %102 = vst.msk [vmem:[#allocation5] sm:$0x1] %vm101_vm5, %v79_v40  ;;  %v99_v43 = vrot.slane %v98_v41, 1  ;;  %v85_v44 = vrot.slane %v84_v42, 1 }
  0xa6   :  { %v100_v45 = vadd.f32 %v99_v43, %v98_v41  ;;  %v86_v46 = vadd.f32 %v85_v44, %v84_v42 }
  0xa8   :  { %105 = vst.msk [vmem:[#allocation5 + $0x3] sm:$0x1] %vm101_vm5, %v100_v45  ;;  %103 = vst.msk [vmem:[#allocation5 + $0x1] sm:$0x1] %vm101_vm5, %v86_v46 }
  0xa9   :  { %169 = shalt.err (!%p166_p12)
}
  0xaa   :  { %s170_s6 = scalar_lea.hbm %s248_s2, 64 }
  0xab   :  { %p171_p13 = scmp.ne.s32.totalorder %s248_s2, %s170_s6  ;;  %p174_p0 = scmp.lt.u32.totalorder %s170_s6, %s248_s2 }
  0xad   :  { %p176_p1 = pnand %p174_p0, %p171_p13 }
  0xaf   :  { %179 = shalt.err (!%p176_p1)
}
  0xb0   :  { %s189_s11 = smov 16   ;;  %s190_s12 = smov 1  }
  0xb1   :  { %117 = dma.vmem_to_hbm [thread:$0]  %s112_s30, 64, %s248_s2, [#allocation4], %s189_s11, %s189_s11, %s190_s12  }
  0xb2   :  { %182 = dma.done.wait [#allocation4], 64  }
  0xb3   :  { %183 = vsyncadd [#allocation4], 4294967232 }
  0xb4   :  { %121 = vsyncpa [#allocation3], 1 }
  0xb5   :  { %122 = vsyncpa [#allocation4], 1 }

</bundles_post_ra>
